<compile_context>
chip_gen: v7x
topology: tpu7x:2x2x1
jax: 0.10.0
libtpu: 0.0.40
codegen_flags: <defaults>
</compile_context>

<pallas_src>
import jax
import jax.numpy as jnp
from jax.experimental import pallas as pl
from jax.experimental.pallas import tpu as pltpu


def _ori_mhs_kernel(x_ref, wuv_ref, buv_ref, vt_ref, c_ref, o_ref):
    # x_ref   : (Bt*S, E)     tokens of Bt batches, folded into the matmul M dim
    # wuv_ref : (E, 2H)       [Wu^T | Ww^T]   (fused selection_u / selection_w)
    # buv_ref : (1, 2H)       [bu   | bw]
    # vt_ref  : (H, Lt)       V^T tile (label projection)
    # c_ref   : (1, Lt)       V.hidden_bias + vb tile (hoisted to wrapper)
    # o_ref   : (Bt, S, Lt*S) scores; column l*S + t == (label l, key position t)
    Bt, S, _ = o_ref.shape
    H = wuv_ref.shape[1] // 2
    Lt = vt_ref.shape[1]

    # One fused MXU projection with M = Bt*S rows (f32 accumulation).
    y = jnp.dot(x_ref[...], wuv_ref[...],
                preferred_element_type=jnp.float32) + buv_ref[...]
    left = y[:, :H]                       # (Bt*S, H) query-side hidden states
    right = y[:, H:]                      # (Bt*S, H) key-side hidden states

    # Label projection: canonical (M,K)x(K,N) matmuls against V^T.
    a = jnp.dot(left, vt_ref[...], preferred_element_type=jnp.float32)   # (Bt*S, Lt)
    b = jnp.dot(right, vt_ref[...], preferred_element_type=jnp.float32)  # (Bt*S, Lt)
    b = b + c_ref[...]                    # + (V.bias + vb), constant over (s, t)
    bt = b.T                              # (Lt, Bt*S): transpose the small result

    # out[bi, s, l*S + t] = a[bi*S + s, l] + bt[l, bi*S + t]
    # Static unroll; the wrapper keeps Bt*Lt small.  Each store is a full
    # (S, S) slab — unmasked/lane-dense whenever S is a multiple of 128.
    for bi in range(Bt):
        a_b = a[bi * S:(bi + 1) * S, :]           # (S, Lt)
        bt_b = bt[:, bi * S:(bi + 1) * S]         # (Lt, S)
        for l in range(Lt):
            o_ref[bi, :, l * S:(l + 1) * S] = (
                a_b[:, l:l + 1] + bt_b[l:l + 1, :]).astype(o_ref.dtype)


def _pick_blocks(B, S, L, itemsize,
                 max_rows=512, out_block_budget=8 * 1024 * 1024, max_unroll=64):
    """Choose (Bt, Lt) batch/label tile sizes."""
    # Batch tile: fold as many batches as possible into the matmul M dim
    # (target a few hundred rows) while keeping the static store unroll small.
    # Bt must divide B; if Bt < B, the flattened-x block needs Bt*S % 8 == 0.
    Bt = 1
    for d in range(1, B + 1):
        if B % d:
            continue
        if d != B and (d * S) % 8:
            continue
        if d * S > max(max_rows, S):
            continue
        if d != 1 and d * L > max_unroll:
            continue
        Bt = d
    # Label tile: full L unless the output block would blow the per-buffer VMEM
    # budget (important on v7x, 64 MiB VMEM).  A proper tile needs Lt % 128 == 0
    # so the V^T / c / output BlockSpecs stay (8,128)-aligned.
    Lt = L
    if Bt * S * L * S * itemsize > out_block_budget:
        for cand in range(L, 0, -1):
            if (L % cand == 0 and cand % 128 == 0 and
                    Bt * S * cand * S * itemsize <= out_block_budget):
                Lt = cand
                break
    return Bt, Lt


def ori_mhs_layer(x, wu, bu, ww, bw, v_w, v_b, hidden_bias):
    """OriMHSLayer.forward.

    x: (B, S, E)
    wu, ww: (H, E)   selection_u / selection_w weights (nn.Linear layout)
    bu, bw: (H,)     their biases
    v_w: (L, H), v_b: (L,)   label projection
    hidden_bias: (H,)        self.bias
    Returns: (B, S, L, S)
    """
    B, S, E = x.shape
    H = wu.shape[0]
    L = v_w.shape[0]
    assert wu.shape == (H, E) and ww.shape == (H, E)
    assert bu.shape == (H,) and bw.shape == (H,)
    assert v_w.shape == (L, H) and v_b.shape == (L,) and hidden_bias.shape == (H,)

    # One-time parameter preprocessing: fused projection weights, transposed
    # label projection, and the grid-invariant constant c = V.bias + vb.
    wuv = jnp.concatenate([wu.T, ww.T], axis=1)               # (E, 2H)
    buv = jnp.concatenate([bu, bw]).reshape(1, 2 * H)         # (1, 2H)
    vt = v_w.T                                                # (H, L)
    c = (jnp.sum(v_w * hidden_bias[None, :], axis=1) + v_b).reshape(1, L)

    itemsize = jnp.dtype(x.dtype).itemsize
    Bt, Lt = _pick_blocks(B, S, L, itemsize)
    nb, nl = B // Bt, L // Lt

    # Free metadata reshape: fold batch into the matmul M dimension.
    x2d = x.reshape(B * S, E)

    # Rough per-step VMEM need (double-buffered blocks + resident params).
    blk_bytes = (2 * (Bt * S * E + Bt * S * Lt * S)
                 + E * 2 * H + 2 * H + H * Lt + Lt) * 4
    vmem_limit = int(min(100 * 1024 * 1024, max(32 * 1024 * 1024, 2 * blk_bytes)))

    out = pl.pallas_call(
        _ori_mhs_kernel,
        out_shape=jax.ShapeDtypeStruct((B, S, L * S), x.dtype),
        grid=(nb, nl),
        in_specs=[
            pl.BlockSpec((Bt * S, E), lambda b, lt: (b, 0)),   # x (batch-folded)
            pl.BlockSpec((E, 2 * H), lambda b, lt: (0, 0)),    # [Wu^T|Ww^T] resident
            pl.BlockSpec((1, 2 * H), lambda b, lt: (0, 0)),    # [bu|bw]
            pl.BlockSpec((H, Lt), lambda b, lt: (0, lt)),      # V^T tile
            pl.BlockSpec((1, Lt), lambda b, lt: (0, lt)),      # V.bias + vb tile
        ],
        out_specs=pl.BlockSpec((Bt, S, Lt * S), lambda b, lt: (b, 0, lt)),
        compiler_params=pltpu.CompilerParams(
            dimension_semantics=("parallel", "parallel"),
            vmem_limit_bytes=vmem_limit),
    )(x2d, wuv, buv, vt, c)

    # Free metadata reshape to the PyTorch layout (B, S, L, S) — no transpose.
    return out.reshape(B, S, L, S)


def _reference(x, wu, bu, ww, bw, v_w, v_b, hidden_bias):
    """Faithful translation of the PyTorch forward (materializes (B,S,S,H))."""
    left = x @ wu.T + bu                                   # (B, S, H)
    right = x @ ww.T + bw                                  # (B, S, H)
    outer = left[:, :, None, :] + right[:, None, :, :]     # (B, S, S, H)
    outer = outer + hidden_bias
    out = jnp.einsum("bsth,lh->bstl", outer, v_w) + v_b    # (B, S, S, L)
    return out.transpose(0, 1, 3, 2)                       # (B, S, L, S)


if __name__ == "__main__":
    # Small shapes consistent with the module: batch=2, seq=8, input=32,
    # hidden=32, num_labels=4.
    B, S, E, H, L = 2, 8, 32, 32, 4

    key = jax.random.PRNGKey(0)
    kx, k1, k2, k3, k4, k5, k6, k7 = jax.random.split(key, 8)

    x = jax.random.normal(kx, (B, S, E), dtype=jnp.float32)

    bound_e = 1.0 / (E ** 0.5)
    bound_h = 1.0 / (H ** 0.5)
    wu = jax.random.uniform(k1, (H, E), jnp.float32, -bound_e, bound_e)
    bu = jax.random.uniform(k2, (H,), jnp.float32, -bound_e, bound_e)
    ww = jax.random.uniform(k3, (H, E), jnp.float32, -bound_e, bound_e)
    bw = jax.random.uniform(k4, (H,), jnp.float32, -bound_e, bound_e)
    v_w = jax.random.uniform(k5, (L, H), jnp.float32, -bound_h, bound_h)
    v_b = jax.random.uniform(k6, (L,), jnp.float32, -bound_h, bound_h)
    # Module initializes self.bias to zeros; use small nonzero values so the
    # shared-bias path is actually exercised.
    hidden_bias = 0.1 * jax.random.normal(k7, (H,), dtype=jnp.float32)

    out = ori_mhs_layer(x, wu, bu, ww, bw, v_w, v_b, hidden_bias)
    out = jax.block_until_ready(out)

    ref = _reference(x, wu, bu, ww, bw, v_w, v_b, hidden_bias)
    assert out.shape == (B, S, L, S), out.shape
    err = float(jnp.max(jnp.abs(out - ref)))
    assert jnp.allclose(out, ref, atol=1e-4, rtol=1e-4), err

    print("KERNEL_OK")
</pallas_src>

<mosaic_0001>
module attributes {stable_mosaic.version = 11 : i64} {
  func.func @_ori_mhs_kernel(%arg0: i32, %arg1: i32, %arg2: memref<16x32xf32, #tpu.memory_space<vmem>>, %arg3: memref<32x64xf32, #tpu.memory_space<vmem>>, %arg4: memref<1x64xf32, #tpu.memory_space<vmem>>, %arg5: memref<32x4xf32, #tpu.memory_space<vmem>>, %arg6: memref<1x4xf32, #tpu.memory_space<vmem>>, %arg7: memref<2x8x32xf32, #tpu.memory_space<vmem>>) attributes {dimension_semantics = [#tpu.dimension_semantics<parallel>, #tpu.dimension_semantics<parallel>], iteration_bounds = array<i64: 1, 1>, scalar_prefetch = 0 : i64, scratch_operands = 0 : i64, tpu.core_type = #tpu.core_type<tc>, window_params = [{transform_indices = @transform_0, window_bounds = array<i64: 16, 32>}, {pipeline_mode = #tpu.pipeline_mode<synchronous>, transform_indices = @transform_1, window_bounds = array<i64: 32, 64>}, {pipeline_mode = #tpu.pipeline_mode<synchronous>, transform_indices = @transform_2, window_bounds = array<i64: 1, 64>}, {transform_indices = @transform_3, window_bounds = array<i64: 32, 4>}, {transform_indices = @transform_4, window_bounds = array<i64: 1, 4>}, {transform_indices = @transform_5, window_bounds = array<i64: 2, 8, 32>}]} {
    %c0 = arith.constant 0 : index
    %c0_0 = arith.constant 0 : index
    %0 = vector.load %arg2[%c0, %c0_0] : memref<16x32xf32, #tpu.memory_space<vmem>>, vector<16x32xf32>
    %c0_1 = arith.constant 0 : index
    %c0_2 = arith.constant 0 : index
    %1 = vector.load %arg3[%c0_1, %c0_2] : memref<32x64xf32, #tpu.memory_space<vmem>>, vector<32x64xf32>
    %cst = arith.constant dense<0.000000e+00> : vector<16x64xf32>
    %2 = tpu.matmul %0, %1, %cst {dimension_numbers = #tpu.dot_dimension_numbers<[1], [0], [0], [1], [0, 0, 1, 1], [], []>} : vector<16x32xf32>, vector<32x64xf32>, vector<16x64xf32> -> vector<16x64xf32>
    %c0_3 = arith.constant 0 : index
    %c0_4 = arith.constant 0 : index
    %3 = vector.load %arg4[%c0_3, %c0_4] : memref<1x64xf32, #tpu.memory_space<vmem>>, vector<1x64xf32>
    %4 = vector.broadcast %3 : vector<1x64xf32> to vector<16x64xf32>
    %5 = arith.addf %2, %4 : vector<16x64xf32>
    %6 = vector.extract_strided_slice %5 {offsets = [0, 0], sizes = [16, 32], strides = [1, 1]} : vector<16x64xf32> to vector<16x32xf32>
    %7 = vector.extract_strided_slice %5 {offsets = [0, 32], sizes = [16, 32], strides = [1, 1]} : vector<16x64xf32> to vector<16x32xf32>
    %c0_5 = arith.constant 0 : index
    %c0_6 = arith.constant 0 : index
    %8 = vector.load %arg5[%c0_5, %c0_6] : memref<32x4xf32, #tpu.memory_space<vmem>>, vector<32x4xf32>
    %cst_7 = arith.constant dense<0.000000e+00> : vector<16x4xf32>
    %9 = tpu.matmul %6, %8, %cst_7 {dimension_numbers = #tpu.dot_dimension_numbers<[1], [0], [0], [1], [0, 0, 1, 1], [], []>} : vector<16x32xf32>, vector<32x4xf32>, vector<16x4xf32> -> vector<16x4xf32>
    %c0_8 = arith.constant 0 : index
    %c0_9 = arith.constant 0 : index
    %10 = vector.load %arg5[%c0_8, %c0_9] : memref<32x4xf32, #tpu.memory_space<vmem>>, vector<32x4xf32>
    %cst_10 = arith.constant dense<0.000000e+00> : vector<16x4xf32>
    %11 = tpu.matmul %7, %10, %cst_10 {dimension_numbers = #tpu.dot_dimension_numbers<[1], [0], [0], [1], [0, 0, 1, 1], [], []>} : vector<16x32xf32>, vector<32x4xf32>, vector<16x4xf32> -> vector<16x4xf32>
    %c0_11 = arith.constant 0 : index
    %c0_12 = arith.constant 0 : index
    %12 = vector.load %arg6[%c0_11, %c0_12] : memref<1x4xf32, #tpu.memory_space<vmem>>, vector<1x4xf32>
    %13 = vector.broadcast %12 : vector<1x4xf32> to vector<16x4xf32>
    %14 = arith.addf %11, %13 : vector<16x4xf32>
    %15 = tpu.transpose %14, [1, 0] : vector<16x4xf32> -> vector<4x16xf32>
    %16 = vector.extract_strided_slice %9 {offsets = [0, 0], sizes = [8, 4], strides = [1, 1]} : vector<16x4xf32> to vector<8x4xf32>
    %17 = vector.extract_strided_slice %15 {offsets = [0, 0], sizes = [4, 8], strides = [1, 1]} : vector<4x16xf32> to vector<4x8xf32>
    %18 = vector.extract_strided_slice %16 {offsets = [0, 0], sizes = [8, 1], strides = [1, 1]} : vector<8x4xf32> to vector<8x1xf32>
    %19 = vector.extract_strided_slice %17 {offsets = [0, 0], sizes = [1, 8], strides = [1, 1]} : vector<4x8xf32> to vector<1x8xf32>
    %20 = vector.broadcast %18 : vector<8x1xf32> to vector<8x8xf32>
    %21 = vector.broadcast %19 : vector<1x8xf32> to vector<8x8xf32>
    %22 = arith.addf %20, %21 : vector<8x8xf32>
    %c0_13 = arith.constant 0 : index
    %c0_14 = arith.constant 0 : index
    %c0_15 = arith.constant 0 : index
    %23 = vector.load %arg7[%c0_13, %c0_14, %c0_15] : memref<2x8x32xf32, #tpu.memory_space<vmem>>, vector<1x8x8xf32>
    %24 = vector.shape_cast %23 : vector<1x8x8xf32> to vector<8x8xf32>
    %25 = vector.shape_cast %22 : vector<8x8xf32> to vector<1x8x8xf32>
    tpu.vector_store %arg7[%c0_13, %c0_14, %c0_15], %25 {strides = array<i32>} : memref<2x8x32xf32, #tpu.memory_space<vmem>>, vector<1x8x8xf32>,
    %26 = vector.extract_strided_slice %16 {offsets = [0, 1], sizes = [8, 1], strides = [1, 1]} : vector<8x4xf32> to vector<8x1xf32>
    %27 = vector.extract_strided_slice %17 {offsets = [1, 0], sizes = [1, 8], strides = [1, 1]} : vector<4x8xf32> to vector<1x8xf32>
    %28 = vector.broadcast %26 : vector<8x1xf32> to vector<8x8xf32>
    %29 = vector.broadcast %27 : vector<1x8xf32> to vector<8x8xf32>
    %30 = arith.addf %28, %29 : vector<8x8xf32>
    %c0_16 = arith.constant 0 : index
    %c0_17 = arith.constant 0 : index
    %c8 = arith.constant 8 : index
    %31 = vector.load %arg7[%c0_16, %c0_17, %c8] : memref<2x8x32xf32, #tpu.memory_space<vmem>>, vector<1x8x8xf32>
    %32 = vector.shape_cast %31 : vector<1x8x8xf32> to vector<8x8xf32>
    %33 = vector.shape_cast %30 : vector<8x8xf32> to vector<1x8x8xf32>
    tpu.vector_store %arg7[%c0_16, %c0_17, %c8], %33 {strides = array<i32>} : memref<2x8x32xf32, #tpu.memory_space<vmem>>, vector<1x8x8xf32>,
    %34 = vector.extract_strided_slice %16 {offsets = [0, 2], sizes = [8, 1], strides = [1, 1]} : vector<8x4xf32> to vector<8x1xf32>
    %35 = vector.extract_strided_slice %17 {offsets = [2, 0], sizes = [1, 8], strides = [1, 1]} : vector<4x8xf32> to vector<1x8xf32>
    %36 = vector.broadcast %34 : vector<8x1xf32> to vector<8x8xf32>
    %37 = vector.broadcast %35 : vector<1x8xf32> to vector<8x8xf32>
    %38 = arith.addf %36, %37 : vector<8x8xf32>
    %c0_18 = arith.constant 0 : index
    %c0_19 = arith.constant 0 : index
    %c16 = arith.constant 16 : index
    %39 = vector.load %arg7[%c0_18, %c0_19, %c16] : memref<2x8x32xf32, #tpu.memory_space<vmem>>, vector<1x8x8xf32>
    %40 = vector.shape_cast %39 : vector<1x8x8xf32> to vector<8x8xf32>
    %41 = vector.shape_cast %38 : vector<8x8xf32> to vector<1x8x8xf32>
    tpu.vector_store %arg7[%c0_18, %c0_19, %c16], %41 {strides = array<i32>} : memref<2x8x32xf32, #tpu.memory_space<vmem>>, vector<1x8x8xf32>,
    %42 = vector.extract_strided_slice %16 {offsets = [0, 3], sizes = [8, 1], strides = [1, 1]} : vector<8x4xf32> to vector<8x1xf32>
    %43 = vector.extract_strided_slice %17 {offsets = [3, 0], sizes = [1, 8], strides = [1, 1]} : vector<4x8xf32> to vector<1x8xf32>
    %44 = vector.broadcast %42 : vector<8x1xf32> to vector<8x8xf32>
    %45 = vector.broadcast %43 : vector<1x8xf32> to vector<8x8xf32>
    %46 = arith.addf %44, %45 : vector<8x8xf32>
    %c0_20 = arith.constant 0 : index
    %c0_21 = arith.constant 0 : index
    %c24 = arith.constant 24 : index
    %47 = vector.load %arg7[%c0_20, %c0_21, %c24] : memref<2x8x32xf32, #tpu.memory_space<vmem>>, vector<1x8x8xf32>
    %48 = vector.shape_cast %47 : vector<1x8x8xf32> to vector<8x8xf32>
    %49 = vector.shape_cast %46 : vector<8x8xf32> to vector<1x8x8xf32>
    tpu.vector_store %arg7[%c0_20, %c0_21, %c24], %49 {strides = array<i32>} : memref<2x8x32xf32, #tpu.memory_space<vmem>>, vector<1x8x8xf32>,
    %50 = vector.extract_strided_slice %9 {offsets = [8, 0], sizes = [8, 4], strides = [1, 1]} : vector<16x4xf32> to vector<8x4xf32>
    %51 = vector.extract_strided_slice %15 {offsets = [0, 8], sizes = [4, 8], strides = [1, 1]} : vector<4x16xf32> to vector<4x8xf32>
    %52 = vector.extract_strided_slice %50 {offsets = [0, 0], sizes = [8, 1], strides = [1, 1]} : vector<8x4xf32> to vector<8x1xf32>
    %53 = vector.extract_strided_slice %51 {offsets = [0, 0], sizes = [1, 8], strides = [1, 1]} : vector<4x8xf32> to vector<1x8xf32>
    %54 = vector.broadcast %52 : vector<8x1xf32> to vector<8x8xf32>
    %55 = vector.broadcast %53 : vector<1x8xf32> to vector<8x8xf32>
    %56 = arith.addf %54, %55 : vector<8x8xf32>
    %c1 = arith.constant 1 : index
    %c0_22 = arith.constant 0 : index
    %c0_23 = arith.constant 0 : index
    %57 = vector.load %arg7[%c1, %c0_22, %c0_23] : memref<2x8x32xf32, #tpu.memory_space<vmem>>, vector<1x8x8xf32>
    %58 = vector.shape_cast %57 : vector<1x8x8xf32> to vector<8x8xf32>
    %59 = vector.shape_cast %56 : vector<8x8xf32> to vector<1x8x8xf32>
    tpu.vector_store %arg7[%c1, %c0_22, %c0_23], %59 {strides = array<i32>} : memref<2x8x32xf32, #tpu.memory_space<vmem>>, vector<1x8x8xf32>,
    %60 = vector.extract_strided_slice %50 {offsets = [0, 1], sizes = [8, 1], strides = [1, 1]} : vector<8x4xf32> to vector<8x1xf32>
    %61 = vector.extract_strided_slice %51 {offsets = [1, 0], sizes = [1, 8], strides = [1, 1]} : vector<4x8xf32> to vector<1x8xf32>
    %62 = vector.broadcast %60 : vector<8x1xf32> to vector<8x8xf32>
    %63 = vector.broadcast %61 : vector<1x8xf32> to vector<8x8xf32>
    %64 = arith.addf %62, %63 : vector<8x8xf32>
    %c1_24 = arith.constant 1 : index
    %c0_25 = arith.constant 0 : index
    %c8_26 = arith.constant 8 : index
    %65 = vector.load %arg7[%c1_24, %c0_25, %c8_26] : memref<2x8x32xf32, #tpu.memory_space<vmem>>, vector<1x8x8xf32>
    %66 = vector.shape_cast %65 : vector<1x8x8xf32> to vector<8x8xf32>
    %67 = vector.shape_cast %64 : vector<8x8xf32> to vector<1x8x8xf32>
    tpu.vector_store %arg7[%c1_24, %c0_25, %c8_26], %67 {strides = array<i32>} : memref<2x8x32xf32, #tpu.memory_space<vmem>>, vector<1x8x8xf32>,
    %68 = vector.extract_strided_slice %50 {offsets = [0, 2], sizes = [8, 1], strides = [1, 1]} : vector<8x4xf32> to vector<8x1xf32>
    %69 = vector.extract_strided_slice %51 {offsets = [2, 0], sizes = [1, 8], strides = [1, 1]} : vector<4x8xf32> to vector<1x8xf32>
    %70 = vector.broadcast %68 : vector<8x1xf32> to vector<8x8xf32>
    %71 = vector.broadcast %69 : vector<1x8xf32> to vector<8x8xf32>
    %72 = arith.addf %70, %71 : vector<8x8xf32>
    %c1_27 = arith.constant 1 : index
    %c0_28 = arith.constant 0 : index
    %c16_29 = arith.constant 16 : index
    %73 = vector.load %arg7[%c1_27, %c0_28, %c16_29] : memref<2x8x32xf32, #tpu.memory_space<vmem>>, vector<1x8x8xf32>
    %74 = vector.shape_cast %73 : vector<1x8x8xf32> to vector<8x8xf32>
    %75 = vector.shape_cast %72 : vector<8x8xf32> to vector<1x8x8xf32>
    tpu.vector_store %arg7[%c1_27, %c0_28, %c16_29], %75 {strides = array<i32>} : memref<2x8x32xf32, #tpu.memory_space<vmem>>, vector<1x8x8xf32>,
    %76 = vector.extract_strided_slice %50 {offsets = [0, 3], sizes = [8, 1], strides = [1, 1]} : vector<8x4xf32> to vector<8x1xf32>
    %77 = vector.extract_strided_slice %51 {offsets = [3, 0], sizes = [1, 8], strides = [1, 1]} : vector<4x8xf32> to vector<1x8xf32>
    %78 = vector.broadcast %76 : vector<8x1xf32> to vector<8x8xf32>
    %79 = vector.broadcast %77 : vector<1x8xf32> to vector<8x8xf32>
    %80 = arith.addf %78, %79 : vector<8x8xf32>
    %c1_30 = arith.constant 1 : index
    %c0_31 = arith.constant 0 : index
    %c24_32 = arith.constant 24 : index
    %81 = vector.load %arg7[%c1_30, %c0_31, %c24_32] : memref<2x8x32xf32, #tpu.memory_space<vmem>>, vector<1x8x8xf32>
    %82 = vector.shape_cast %81 : vector<1x8x8xf32> to vector<8x8xf32>
    %83 = vector.shape_cast %80 : vector<8x8xf32> to vector<1x8x8xf32>
    tpu.vector_store %arg7[%c1_30, %c0_31, %c24_32], %83 {strides = array<i32>} : memref<2x8x32xf32, #tpu.memory_space<vmem>>, vector<1x8x8xf32>,
    return
  }
  func.func @transform_0(%arg0: i32, %arg1: i32) -> (i32, i32) {
    %c0_i32 = arith.constant 0 : i32
    %c0_i32_0 = arith.constant 0 : i32
    return %arg0, %c0_i32 : i32, i32
  }
  func.func @transform_1(%arg0: i32, %arg1: i32) -> (i32, i32) {
    %c0_i32 = arith.constant 0 : i32
    %c0_i32_0 = arith.constant 0 : i32
    %c0_i32_1 = arith.constant 0 : i32
    return %c0_i32, %c0_i32_0 : i32, i32
  }
  func.func @transform_2(%arg0: i32, %arg1: i32) -> (i32, i32) {
    %c0_i32 = arith.constant 0 : i32
    %c0_i32_0 = arith.constant 0 : i32
    %c0_i32_1 = arith.constant 0 : i32
    return %c0_i32, %c0_i32_0 : i32, i32
  }
  func.func @transform_3(%arg0: i32, %arg1: i32) -> (i32, i32) {
    %c0_i32 = arith.constant 0 : i32
    %c0_i32_0 = arith.constant 0 : i32
    return %c0_i32, %arg1 : i32, i32
  }
  func.func @transform_4(%arg0: i32, %arg1: i32) -> (i32, i32) {
    %c0_i32 = arith.constant 0 : i32
    %c0_i32_0 = arith.constant 0 : i32
    return %c0_i32, %arg1 : i32, i32
  }
  func.func @transform_5(%arg0: i32, %arg1: i32) -> (i32, i32, i32) {
    %c0_i32 = arith.constant 0 : i32
    %c0_i32_0 = arith.constant 0 : i32
    return %arg0, %c0_i32, %arg1 : i32, i32, i32
  }
}

</mosaic_0001>

<bundles_post_ra>
// kernel: tpu_custom_call.1
= control target key start
LH: loop header
LB: loop body
LE: loop exit
PB: predicated region body
PF: predicated region fallthrough
CT: control target
= control target key end

     0   :  { %10 = vsyncpa [#allocation3], 0  ;;  %s714_s0 = inlined_call_operand.hbm [shape: f32[16,32], index: 0, kind: input, shape index: {}]   ;;  %s715_s1 = inlined_call_operand.vmem [shape: f32[32,64], index: 1, kind: input, shape index: {}]   ;;  %s716_s2 = inlined_call_operand.vmem [shape: f32[1,64], index: 2, kind: input, shape index: {}]   ;;  %s717_s3 = inlined_call_operand.vmem [shape: f32[32,4], index: 3, kind: input, shape index: {}]   ;;  %s718_s4 = inlined_call_operand.vmem [shape: f32[1,4], index: 4, kind: input, shape index: {}]   ;;  %s719_s5 = inlined_call_operand.hbm [shape: f32[2,8,32], index: 5, kind: output, shape index: {}]  }
   0x1   :  { %11 = vsyncpa [#allocation4], 0  ;;  %s602_s18 = smov [#allocation2]   ;;  %s554_s22 = scalar_lea.hbm %s714_s0, 256 }
   0x2   :  { %s17_s19 = sshll.u32 %s602_s18, 4  ;;  %p555_p0 = scmp.ne.s32.totalorder %s714_s0, %s554_s22  ;;  %s18_s19 = int_to_ptr.vmem [resolvable:$true] %s17_s19 }
   0x3   :  { %p558_p1 = scmp.lt.u32.totalorder %s554_s22, %s714_s0 }
   0x5   :  { %p560_p2 = pnand %p558_p1, %p555_p0 }
   0x7   :  { %563 = shalt.err (!%p560_p2)
}
   0x8   :  { %s564_s27 = scalar_lea.vmem %s18_s19, 256  ;;  %p569_p4 = scmp.lt.s32.totalorder %s18_s19, %s18_s19 }
   0x9   :  { %p565_p3 = scmp.ne.s32.totalorder %s18_s19, %s564_s27  ;;  %p570_p5 = scmp.lt.s32.totalorder %s564_s27, %s564_s27 }
   0xb   :  { %p571_p6 = por %p570_p5, %p569_p4 }
   0xd   :  { %p572_p7 = pnand %p571_p6, %p565_p3 }
   0xf   :  { %575 = shalt.err (!%p572_p7)
}
  0x10   :  { %s603_s28 = smov 128   ;;  %s604_s29 = smov 8  }
  0x11   :  { %23 = dma.hbm_to_vmem [thread:$0]  %s714_s0, 256, %s18_s19, [#allocation3], %s603_s28, %s603_s28, %s604_s29  }
  0x12   :  { %598 = dma.done.wait [#allocation3], 256  }
  0x13   :  { %599 = vsyncadd [#allocation3], 4294967040  ;;  %vm48_vm0 = vcmask 261120   ;;  %v37_v0 = vld [vmem:[%s715_s1] sm:$0xff]  ;;  %v38_v1 = vld [vmem:[%s715_s1 + $0x8] sm:$0xff]  ;;  %v605_v14 = vmov 0   ;;  %v342_v34 = vlaneseq }
  0x14   :  { %v39_v2 = vld [vmem:[%s715_s1 + $0x10] sm:$0xff]  ;;  %v508_v3 = vpack.c.bf16 %v38_v1, %v37_v0  ;;  %v40_v4 = vld [vmem:[%s715_s1 + $0x18] sm:$0xff]  ;;  %v35_v5 = vld [vmem:[#allocation2] sm:$0xff]  ;;  %545 = vset.pattern.permute.xlu1 %v605_v14  ;;  %s606_s23 = smov 96   ;;  %v607_v20 = vmov 2   ;;  %v608_v25 = vmov 3  }
  0x15   :  { %v512_v6 = vpack.c.bf16 %v40_v4, %v39_v2  ;;  %483 = vmatprep.mubr.msk.f32.mxu0 %vm48_vm0, %v35_v5  ;;  %v130_v7 = vld [vmem:[%s717_s3] sm:$0xff]  ;;  %v131_v8 = vld [vmem:[%s717_s3 + $0x8] sm:$0xff]  ;;  %v132_v11 = vld [vmem:[%s717_s3 + $0x10] sm:$0xff]  ;;  %548 = vset.pattern.permute.xlu0 %v607_v20  ;;  %v609_v26 = vmov 1   ;;  %v343_v37 = vshrl.u32 %v342_v34, 7  ;;  %vm347_vm1 = vcmask 64512  }
  0x16   :  { %509 = vmatprep.subr.bf16.mxu0 %v508_v3  ;;  %v516_v9 = vpack.c.bf16 %v131_v8, %v130_v7  ;;  %v36_v10 = vld [vmem:[#allocation2 + $0x8] sm:$0xff]  ;;  %v133_v12 = vld [vmem:[%s717_s3 + $0x18] sm:$0xff]  ;;  %v449_v15 = vld [vmem:[%s716_s2] ss:$0 sm:$0xff]  ;;  %s611_s24 = smov 16   ;;  %s612_s25 = smov 24  }
  0x17   :  { %511 = vmatpush3.bf16.msra.mxu0 %v508_v3  ;;  %v520_v13 = vpack.c.bf16 %v133_v12, %v132_v11  ;;  %v454_v27 = vld [vmem:[%s718_s4] ss:$0 sm:$0xff]  ;;  %v344_v40 = vsub.s32 0, %v343_v37  ;;  %v355_v41 = vsub.s32 1, %v343_v37  ;;  %v370_v45 = vsub.s32 2, %v343_v37  ;;  %s610_s4 = smov 120  }
  0x18   :  { %513 = vmatprep.subr.bf16.mxu0 %v512_v6  ;;  %517 = vmatprep.subr.bf16.mxu1 %v516_v9  ;;  %v385_v51 = vsub.s32 3, %v343_v37  ;;  %vm362_vm2 = vcmask 130112   ;;  %vm377_vm3 = vcmask 195712   ;;  %vm392_vm4 = vcmask 261312   ;;  %s613_s26 = smov [#allocation5]  }
  0x19   :  { %519 = vmatpush3.bf16.msra.mxu1 %v516_v9  ;;  %s437_s27 = sshll.u32 %s613_s26, 4  ;;  %s438_s27 = int_to_ptr.vmem [resolvable:$true] %s437_s27 }
  0x1a   :  { %521 = vmatprep.subr.bf16.mxu1 %v520_v13  ;;  %s576_s30 = scalar_lea.vmem %s438_s27, 256  ;;  %p581_p9 = scmp.lt.s32.totalorder %s438_s27, %s438_s27 }
  0x1b   :  { %515 = vmatpush3.bf16.msra.mxu0 %v512_v6  ;;  %p577_p8 = scmp.ne.s32.totalorder %s438_s27, %s576_s30  ;;  %p582_p10 = scmp.lt.s32.totalorder %s576_s30, %s576_s30 }
  0x1c   :  { %525 = vmatprep.subr.bf16.mxu0 %v516_v9 }
  0x1d   :  { %523 = vmatpush3.bf16.msra.mxu1 %v520_v13  ;;  %p583_p11 = por %p582_p10, %p581_p9 }
  0x1e   :  { %484 = vmatmul.mubr.msk.f32.vlgmr.msra.gmra.mrb[0].mxu0 %vm48_vm0, %v36_v10 }
  0x1f   :  { %527 = vmatpush3.bf16.msra.mxu0 %v516_v9  ;;  %p584_p12 = pnand %p583_p11, %p577_p8 }
  0x20   :  { %529 = vmatprep.subr.bf16.mxu0 %v520_v13 }
  0x23   :  { %531 = vmatpush3.bf16.msra.mxu0 %v520_v13 }
  0xf1   :  { %v485_v16 = vpop.f32.mrb[0].mxu0 }
  0xf2   :  { %v121_v17 = vpop.f32.mrb[1].mxu0  ;;  %v127_v19 = vadd.f32 %v485_v16, %v449_v15 }
  0xf3   :  { %v122_v18 = vadd.f32 %v449_v15, %v121_v17 }
  0xf5   :  { %222 = vrot.lane.b32.xlu0 %v122_v18, %s606_s23  ;;  %494 = vmatprep.mubr.msk.f32.mxu1 %vm48_vm0, %v122_v18 }
  0xf6   :  { %495 = vmatmul.mubr.msk.f32.vlgmr.msra.gmra.mrb[0].mxu1 %vm48_vm0, %v127_v19 }
  0xf9   :  { %224 = vrot.lane.b32.xlu0 %v127_v19, %s606_s23 }
 0x167   :  { %v223_v21 = vpop.permute.xlu0 %222 }
 0x168   :  { %505 = vmatprep.mubr.msk.f32.mxu0 %vm48_vm0, %v223_v21 }
 0x16b   :  { %v225_v22 = vpop.permute.xlu0 %224 }
 0x16c   :  { %506 = vmatmul.mubr.msk.f32.vlgmr.msra.gmra.mrb[2].mxu0 %vm48_vm0, %v225_v22 }
 0x1c9   :  { %v496_v23 = vpop.f32.mrb[0].mxu1 }
 0x1ca   :  { %396 = vperm.xlu1 %545, %v496_v23   ;;  %v206_v24 = vpop.f32.mrb[1].mxu1 }
 0x1cb   :  { %365 = vperm.xlu0 %548, %v206_v24  }
 0x1ce   :  { %546 = vset.pattern.permute.xlu1 %v607_v20 }
 0x1cf   :  { %413 = vperm.xlu1 %546, %v496_v23   ;;  %549 = vset.pattern.permute.xlu0 %v608_v25 }
 0x1d0   :  { %423 = vperm.xlu0 %549, %v496_v23  }
 0x1d3   :  { %547 = vset.pattern.permute.xlu1 %v609_v26 }
 0x1d4   :  { %551 = vset.pattern.permute.xlu0 %v605_v14  ;;  %350 = vperm.xlu1 %547, %v206_v24  }
 0x1d5   :  { %339 = vperm.xlu0 %551, %v206_v24  }
 0x1d8   :  { %550 = vset.pattern.permute.xlu1 %v608_v25 }
 0x1d9   :  { %552 = vset.pattern.permute.xlu0 %v609_v26  ;;  %380 = vperm.xlu1 %550, %v206_v24  }
 0x1da   :  { %407 = vperm.xlu0 %552, %v496_v23  }
 0x1de   :  { %553 = vset.pattern.permute.xlu0 %v608_v25 }
 0x23f   :  { %v507_v28 = vpop.f32.mrb[2].mxu0 }
 0x240   :  { %v296_v29 = vpop.f32.mrb[3].mxu0  ;;  %v302_v31 = vadd.f32 %v507_v28, %v454_v27 }
 0x241   :  { %v297_v30 = vadd.f32 %v454_v27, %v296_v29 }
 0x243   :  { %305 = vxpose.xlu1.b32.start [1/2] (short) (narrow) %v297_v30, 8 }
 0x247   :  { %306 = vxpose.xlu1.b32.end [2/2] (short) (narrow) %v302_v31, 8 }
 0x249   :  { %v397_v32 = vpop.permute.xlu1 %396 }
 0x24a   :  { %v366_v35 = vpop.permute.xlu0 %365 }
 0x24e   :  { %v414_v33 = vpop.permute.xlu1 %413 }
 0x24f   :  { %v424_v38 = vpop.permute.xlu0 %423 }
 0x253   :  { %v351_v36 = vpop.permute.xlu1 %350 }
 0x254   :  { %v340_v44 = vpop.permute.xlu0 %339 }
 0x258   :  { %v381_v39 = vpop.permute.xlu1 %380 }
 0x259   :  { %v408_v57 = vpop.permute.xlu0 %407 }
 0x2c3   :  { %v321_v42 = vpop.trf.xlu1 }
 0x2c4   :  { %v345_v43 = vrot.slane %v321_v42, %v344_v40  ;;  %v356_v48 = vrot.slane %v321_v42, %v355_v41  ;;  %v371_v49 = vrot.slane %v321_v42, %v370_v45  ;;  %v386_v53 = vrot.slane %v321_v42, %v385_v51 }
 0x2c6   :  { %v346_v46 = vadd.f32 %v345_v43, %v340_v44  ;;  %v399_v47 = vadd.f32 %v397_v32, %v345_v43  ;;  %v357_v50 = vadd.f32 %v356_v48, %v351_v36  ;;  %v372_v52 = vadd.f32 %v371_v49, %v366_v35 }
 0x2c7   :  { %v416_v54 = vadd.f32 %v414_v33, %v371_v49  ;;  %v387_v55 = vadd.f32 %v386_v53, %v381_v39  ;;  %v426_v56 = vadd.f32 %v424_v38, %v386_v53  ;;  %v410_v58 = vadd.f32 %v408_v57, %v356_v48 }
 0x2c8   :  { %401 = vrot.lane.b32.xlu0 %v399_v47, %s610_s4  ;;  %348 = vst.msk [vmem:[#allocation5] sm:$0xff] %vm347_vm1, %v346_v46 }
 0x2cc   :  { %359 = vrot.lane.b32.xlu0 %v357_v50, %s604_s29 }
 0x2d0   :  { %374 = vrot.lane.b32.xlu0 %v372_v52, %s611_s24 }
 0x2d4   :  { %418 = vrot.lane.b32.xlu0 %v416_v54, %s604_s29 }
 0x2d8   :  { %389 = vrot.lane.b32.xlu0 %v387_v55, %s612_s25 }
 0x2dc   :  { %428 = vrot.lane.b32.xlu0 %v426_v56, %s611_s24 }
 0x33a   :  { %v402_v59 = vpop.permute.xlu0 %401 }
 0x33b   :  { %405 = vst.msk [vmem:[#allocation5 + $0x8] sm:$0xff] %vm347_vm1, %v402_v59 }
 0x33c   :  { %411 = vst.msk [vmem:[#allocation5 + $0x8] sm:$0xff] %vm362_vm2, %v410_v58 }
 0x33e   :  { %v360_v60 = vpop.permute.xlu0 %359 }
 0x33f   :  { %363 = vst.msk [vmem:[#allocation5] sm:$0xff] %vm362_vm2, %v360_v60 }
 0x342   :  { %v375_v61 = vpop.permute.xlu0 %374 }
 0x343   :  { %378 = vst.msk [vmem:[#allocation5] sm:$0xff] %vm377_vm3, %v375_v61 }
 0x346   :  { %v419_v62 = vpop.permute.xlu0 %418 }
 0x347   :  { %421 = vst.msk [vmem:[#allocation5 + $0x8] sm:$0xff] %vm377_vm3, %v419_v62 }
 0x34a   :  { %v390_v63 = vpop.permute.xlu0 %389 }
 0x34b   :  { %393 = vst.msk [vmem:[#allocation5] sm:$0xff] %vm392_vm4, %v390_v63 }
 0x34e   :  { %v429_v0 = vpop.permute.xlu0 %428 }
 0x34f   :  { %431 = vst.msk [vmem:[#allocation5 + $0x8] sm:$0xff] %vm392_vm4, %v429_v0 }
 0x350   :  { %587 = shalt.err (!%p584_p12)
}
 0x351   :  { %s588_s8 = scalar_lea.hbm %s719_s5, 256 }
 0x352   :  { %p589_p13 = scmp.ne.s32.totalorder %s719_s5, %s588_s8  ;;  %p592_p0 = scmp.lt.u32.totalorder %s588_s8, %s719_s5 }
 0x354   :  { %p594_p1 = pnand %p592_p0, %p589_p13 }
 0x356   :  { %597 = shalt.err (!%p594_p1)
}
 0x357   :  { %443 = dma.vmem_to_hbm [thread:$0]  %s438_s27, 256, %s719_s5, [#allocation4], %s603_s28, %s603_s28, %s604_s29  }
 0x358   :  { %600 = dma.done.wait [#allocation4], 256  }
 0x359   :  { %601 = vsyncadd [#allocation4], 4294967040 }
 0x35a   :  { %447 = vsyncpa [#allocation3], 1 }
 0x35b   :  { %448 = vsyncpa [#allocation4], 1 }

</bundles_post_ra>
